<compile_context>
chip_gen: v7x
topology: tpu7x:2x2x1
jax: 0.10.0
libtpu: 0.0.40
codegen_flags: <defaults>
</compile_context>

<pallas_src>
import functools
import math

import jax
import jax.numpy as jnp
from jax import lax
from jax.experimental import pallas as pl
from jax.experimental.pallas import tpu as pltpu


def _round_up(x, m):
    return (x + m - 1) // m * m


def _choose_tile(w_total, seq_len):
    """Pick a lane-dense tile width.

    Tiles must (a) be a multiple of 128 lanes (or the full padded width) and
    (b) contain whole length-`seq_len` sequences so the k=3 conv never crosses
    a tile boundary.  Padded width is a multiple of the tile width.
    """
    w128 = _round_up(w_total, 128)
    if w128 <= 2048:                       # small problem: single lane-dense tile
        return w128, w128
    step = seq_len * 128 // math.gcd(seq_len, 128)   # lcm(seq_len, 128)
    tile = max(step, (2048 // step) * step)          # ~2048 lanes per grid step
    return tile, _round_up(w_total, tile)


def _dense_layer_kernel(x_ref, scale_ref, shift_ref, w_ref, b_ref, out_ref,
                        *, seq_len):
    x = x_ref[...]                                   # (Cp, TW) f32, lane-dense
    # BatchNorm1d (inference): folded per-channel affine.
    h = x * scale_ref[...] + shift_ref[...]
    # Exact GELU: 0.5 * h * (1 + erf(h / sqrt(2)))  (matches nn.GELU() default).
    h = 0.5 * h * (1.0 + lax.erf(h * 0.7071067811865476))
    # Dropout(0.2): identity in eval mode.
    # TODO(synk): training-mode dropout (random mask / 1/(1-p) scaling) not implemented.

    cp, tw = h.shape
    # Position of each lane inside its length-`seq_len` sequence.  Tiles start at
    # multiples of the tile width (a multiple of seq_len), so in-tile position
    # equals the global position modulo seq_len.
    pos = lax.broadcasted_iota(jnp.int32, (cp, tw), 1) % seq_len

    # k=3 / padding=1 conv taps via XLU lane rotations + boundary masks.  The
    # mask zero-pads every sequence edge, which also kills any cross-sequence
    # (batch-boundary / tile-wraparound) leakage from the rotation.
    h_m1 = jnp.where(pos == 0, 0.0, pltpu.roll(h, shift=1, axis=1))        # h[:, l-1]
    h_p1 = jnp.where(pos == seq_len - 1, 0.0, pltpu.roll(h, shift=tw - 1, axis=1))  # h[:, l+1]

    # Single fused MXU matmul over all three taps: (G, 3*Cp) @ (3*Cp, TW).
    hh = jnp.concatenate([h_m1, h, h_p1], axis=0)    # sublane-aligned (Cp % 8 == 0)
    conv = jnp.dot(w_ref[...], hh, preferred_element_type=jnp.float32) + b_ref[...]
    out_ref[...] = conv.astype(out_ref.dtype)


def dense_layer_forward(x, gamma, beta, running_mean, running_var,
                        conv_weight, conv_bias, eps=1e-5):
    N, C, L = x.shape
    G = conv_weight.shape[0]
    f32 = jnp.float32
    # Note: keep f32 end-to-end here for exactness; at scale on v6e/v7x the
    # activations/weights feeding jnp.dot (and the conv output) could be bf16.

    # ---- fold BN running stats into a per-channel affine (plain JAX glue) ----
    scale = (gamma / jnp.sqrt(running_var + eps)).astype(f32)
    shift = (beta.astype(f32) - running_mean.astype(f32) * scale)

    # ---- lane-dense layout: channels -> sublanes, batch*length -> lanes ----
    Cp = _round_up(C, 8)                              # sublane-aligned channels
    W_total = N * L
    tile_w, W_pad = _choose_tile(W_total, L)
    n_tiles = W_pad // tile_w

    x_cw = jnp.transpose(x.astype(f32), (1, 0, 2)).reshape(C, W_total)
    x_cw = jnp.pad(x_cw, ((0, Cp - C), (0, W_pad - W_total)))

    scale_p = jnp.pad(scale, (0, Cp - C)).reshape(Cp, 1)
    shift_p = jnp.pad(shift, (0, Cp - C)).reshape(Cp, 1)

    # ---- fuse the three conv taps into one (G, 3*Cp) weight, tap-major ----
    # tap k multiplies input position l-1+k: k=0 -> l-1, k=1 -> l, k=2 -> l+1.
    w_taps = jnp.transpose(conv_weight.astype(f32), (2, 0, 1))     # (3, G, C)
    w_taps = jnp.pad(w_taps, ((0, 0), (0, 0), (0, Cp - C)))        # (3, G, Cp)
    w_fused = jnp.concatenate([w_taps[0], w_taps[1], w_taps[2]], axis=1)  # (G, 3*Cp)
    b = conv_bias.astype(f32).reshape(G, 1)

    kernel = functools.partial(_dense_layer_kernel, seq_len=L)

    cost = pl.CostEstimate(
        flops=2 * G * 3 * Cp * W_pad,
        transcendentals=Cp * W_pad,
        bytes_accessed=4 * (Cp * W_pad + G * W_pad + G * 3 * Cp + 2 * Cp + G),
    )

    conv_cw = pl.pallas_call(
        kernel,
        out_shape=jax.ShapeDtypeStruct((G, W_pad), f32),
        grid_spec=pltpu.PrefetchScalarGridSpec(
            num_scalar_prefetch=0,
            grid=(n_tiles,),
            in_specs=[
                pl.BlockSpec((Cp, tile_w), lambda i: (0, i)),
                pl.BlockSpec((Cp, 1), lambda i: (0, 0)),
                pl.BlockSpec((Cp, 1), lambda i: (0, 0)),
                pl.BlockSpec((G, 3 * Cp), lambda i: (0, 0)),
                pl.BlockSpec((G, 1), lambda i: (0, 0)),
            ],
            out_specs=pl.BlockSpec((G, tile_w), lambda i: (0, i)),
        ),
        compiler_params=pltpu.CompilerParams(
            dimension_semantics=("parallel",),
            vmem_limit_bytes=32 * 1024 * 1024,   # tiles sized well below v7x 64 MiB
        ),
        cost_estimate=cost,
    )(x_cw, scale_p, shift_p, w_fused, b)

    # ---- back to NCL and torch.cat([x, conv(x)], dim=1) in the wrapper ----
    conv_ncl = conv_cw[:, :W_total].reshape(G, N, L)
    conv_ncl = jnp.transpose(conv_ncl, (1, 0, 2)).astype(x.dtype)
    return jnp.concatenate([x, conv_ncl], axis=1)


def dense_layer_ref(x, gamma, beta, running_mean, running_var,
                    conv_weight, conv_bias, eps=1e-5):
    # Pure-JAX reference for sanity checking.
    scale = gamma / jnp.sqrt(running_var + eps)
    shift = beta - running_mean * scale
    h = x * scale[None, :, None] + shift[None, :, None]
    h = 0.5 * h * (1.0 + lax.erf(h * 0.7071067811865476))
    conv = lax.conv_general_dilated(
        h, conv_weight, window_strides=(1,), padding=((1, 1),),
        dimension_numbers=("NCH", "OIH", "NCH"))
    conv = conv + conv_bias[None, :, None]
    return jnp.concatenate([x, conv], axis=1)


if __name__ == "__main__":
    # Small shapes consistent with the module: batch=2, in_channels=4,
    # growth_rate=8, sequence length=16.
    N, C, G, L = 2, 4, 8, 16
    key = jax.random.PRNGKey(0)
    kx, kg, kb, km, kv, kw, kc = jax.random.split(key, 7)

    x = jax.random.normal(kx, (N, C, L), dtype=jnp.float32)

    # Deterministic synthetic parameters (shapes from nn.BatchNorm1d / nn.Conv1d).
    gamma = 1.0 + 0.1 * jax.random.normal(kg, (C,), dtype=jnp.float32)
    beta = 0.1 * jax.random.normal(kb, (C,), dtype=jnp.float32)
    running_mean = 0.1 * jax.random.normal(km, (C,), dtype=jnp.float32)
    running_var = 1.0 + 0.1 * jax.random.uniform(kv, (C,), dtype=jnp.float32)
    conv_weight = 0.2 * jax.random.normal(kw, (G, C, 3), dtype=jnp.float32)
    conv_bias = 0.1 * jax.random.normal(kc, (G,), dtype=jnp.float32)

    out = dense_layer_forward(x, gamma, beta, running_mean, running_var,
                              conv_weight, conv_bias)
    out = jax.block_until_ready(out)

    ref = dense_layer_ref(x, gamma, beta, running_mean, running_var,
                          conv_weight, conv_bias)
    assert out.shape == (N, C + G, L)
    assert jnp.allclose(out, ref, atol=1e-4, rtol=1e-4)

    print("KERNEL_OK")
</pallas_src>

<mosaic_0001>
module attributes {stable_mosaic.version = 11 : i64} {
  func.func @_dense_layer_kernel(%arg0: i32, %arg1: memref<8x128xf32, #tpu.memory_space<vmem>>, %arg2: memref<8x1xf32, #tpu.memory_space<vmem>>, %arg3: memref<8x1xf32, #tpu.memory_space<vmem>>, %arg4: memref<8x24xf32, #tpu.memory_space<vmem>>, %arg5: memref<8x1xf32, #tpu.memory_space<vmem>>, %arg6: memref<8x128xf32, #tpu.memory_space<vmem>>) attributes {dimension_semantics = [#tpu.dimension_semantics<parallel>], iteration_bounds = array<i64: 1>, scalar_prefetch = 0 : i64, scratch_operands = 0 : i64, tpu.core_type = #tpu.core_type<tc>, window_params = [{transform_indices = @transform_0, window_bounds = array<i64: 8, 128>}, {pipeline_mode = #tpu.pipeline_mode<synchronous>, transform_indices = @transform_1, window_bounds = array<i64: 8, 1>}, {pipeline_mode = #tpu.pipeline_mode<synchronous>, transform_indices = @transform_2, window_bounds = array<i64: 8, 1>}, {pipeline_mode = #tpu.pipeline_mode<synchronous>, transform_indices = @transform_3, window_bounds = array<i64: 8, 24>}, {pipeline_mode = #tpu.pipeline_mode<synchronous>, transform_indices = @transform_4, window_bounds = array<i64: 8, 1>}, {transform_indices = @transform_5, window_bounds = array<i64: 8, 128>}]} {
    %c0 = arith.constant 0 : index
    %c0_0 = arith.constant 0 : index
    %0 = vector.load %arg1[%c0, %c0_0] : memref<8x128xf32, #tpu.memory_space<vmem>>, vector<8x128xf32>
    %c0_1 = arith.constant 0 : index
    %c0_2 = arith.constant 0 : index
    %1 = vector.load %arg2[%c0_1, %c0_2] : memref<8x1xf32, #tpu.memory_space<vmem>>, vector<8x1xf32>
    %2 = vector.broadcast %1 : vector<8x1xf32> to vector<8x128xf32>
    %3 = arith.mulf %0, %2 : vector<8x128xf32>
    %c0_3 = arith.constant 0 : index
    %c0_4 = arith.constant 0 : index
    %4 = vector.load %arg3[%c0_3, %c0_4] : memref<8x1xf32, #tpu.memory_space<vmem>>, vector<8x1xf32>
    %5 = vector.broadcast %4 : vector<8x1xf32> to vector<8x128xf32>
    %6 = arith.addf %3, %5 : vector<8x128xf32>
    %cst = arith.constant 5.000000e-01 : f32
    %7 = vector.broadcast %cst : f32 to vector<8x128xf32>
    %8 = arith.mulf %7, %6 : vector<8x128xf32>
    %cst_5 = arith.constant 0.707106769 : f32
    %9 = vector.broadcast %cst_5 : f32 to vector<8x128xf32>
    %10 = arith.mulf %6, %9 : vector<8x128xf32>
    %11 = math.erf %10 : vector<8x128xf32>
    %cst_6 = arith.constant 1.000000e+00 : f32
    %12 = vector.broadcast %cst_6 : f32 to vector<8x128xf32>
    %13 = arith.addf %12, %11 : vector<8x128xf32>
    %14 = arith.mulf %8, %13 : vector<8x128xf32>
    %15 = tpu.iota {dimensions = array<i32: 1>} : vector<8x128xi32>
    %c16_i32 = arith.constant 16 : i32
    %c0_i32 = arith.constant 0 : i32
    %16 = arith.cmpi eq, %c16_i32, %c0_i32 : i32
    %c1_i32 = arith.constant 1 : i32
    %17 = arith.select %16, %c1_i32, %c16_i32 : i32
    %18 = vector.broadcast %17 : i32 to vector<8x128xi32>
    %19 = arith.remsi %15, %18 : vector<8x128xi32>
    %c0_i32_7 = arith.constant 0 : i32
    %20 = vector.broadcast %c0_i32_7 : i32 to vector<8x128xi32>
    %21 = arith.cmpi ne, %19, %20 : vector<8x128xi32>
    %c0_i32_8 = arith.constant 0 : i32
    %22 = vector.broadcast %c0_i32_8 : i32 to vector<8x128xi32>
    %23 = arith.cmpi slt, %19, %22 : vector<8x128xi32>
    %c0_i32_9 = arith.constant 0 : i32
    %24 = arith.cmpi slt, %17, %c0_i32_9 : i32
    %25 = vector.broadcast %24 : i1 to vector<8x128xi1>
    %26 = vector.broadcast %25 : vector<8x128xi1> to vector<8x128xi1>
    %27 = arith.xori %23, %26 : vector<8x128xi1>
    %28 = arith.andi %27, %21 : vector<8x128xi1>
    %29 = vector.broadcast %17 : i32 to vector<8x128xi32>
    %30 = arith.addi %19, %29 : vector<8x128xi32>
    %31 = arith.select %28, %30, %19 : vector<8x128xi1>, vector<8x128xi32>
    %c0_i32_10 = arith.constant 0 : i32
    %32 = vector.broadcast %c0_i32_10 : i32 to vector<8x128xi32>
    %33 = arith.cmpi eq, %31, %32 : vector<8x128xi32>
    %c1_i32_11 = arith.constant 1 : i32
    %34 = tpu.dynamic_rotate %14 by %c1_i32_11 dim 1 : vector<8x128xf32>, i32 -> vector<8x128xf32>
    %cst_12 = arith.constant 0.000000e+00 : f32
    %35 = vector.broadcast %cst_12 : f32 to vector<8x128xf32>
    %36 = arith.select %33, %35, %34 : vector<8x128xi1>, vector<8x128xf32>
    %c15_i32 = arith.constant 15 : i32
    %37 = vector.broadcast %c15_i32 : i32 to vector<8x128xi32>
    %38 = arith.cmpi eq, %31, %37 : vector<8x128xi32>
    %c127_i32 = arith.constant 127 : i32
    %39 = tpu.dynamic_rotate %14 by %c127_i32 dim 1 : vector<8x128xf32>, i32 -> vector<8x128xf32>
    %cst_13 = arith.constant 0.000000e+00 : f32
    %40 = vector.broadcast %cst_13 : f32 to vector<8x128xf32>
    %41 = arith.select %38, %40, %39 : vector<8x128xi1>, vector<8x128xf32>
    %42 = tpu.concatenate %36, %14, %41 in 0 : vector<8x128xf32>, vector<8x128xf32>, vector<8x128xf32> -> vector<24x128xf32>
    %c0_14 = arith.constant 0 : index
    %c0_15 = arith.constant 0 : index
    %43 = vector.load %arg4[%c0_14, %c0_15] : memref<8x24xf32, #tpu.memory_space<vmem>>, vector<8x24xf32>
    %cst_16 = arith.constant dense<0.000000e+00> : vector<8x128xf32>
    %44 = tpu.matmul %43, %42, %cst_16 {dimension_numbers = #tpu.dot_dimension_numbers<[1], [0], [0], [1], [0, 0, 1, 1], [], []>} : vector<8x24xf32>, vector<24x128xf32>, vector<8x128xf32> -> vector<8x128xf32>
    %c0_17 = arith.constant 0 : index
    %c0_18 = arith.constant 0 : index
    %45 = vector.load %arg5[%c0_17, %c0_18] : memref<8x1xf32, #tpu.memory_space<vmem>>, vector<8x1xf32>
    %46 = vector.broadcast %45 : vector<8x1xf32> to vector<8x128xf32>
    %47 = arith.addf %44, %46 : vector<8x128xf32>
    %c0_19 = arith.constant 0 : index
    %c0_20 = arith.constant 0 : index
    %48 = vector.load %arg6[%c0_19, %c0_20] : memref<8x128xf32, #tpu.memory_space<vmem>>, vector<8x128xf32>
    tpu.vector_store %arg6[%c0_19, %c0_20], %47 {strides = array<i32>} : memref<8x128xf32, #tpu.memory_space<vmem>>, vector<8x128xf32>,
    return
  }
  func.func @transform_0(%arg0: i32) -> (i32, i32) {
    %c0_i32 = arith.constant 0 : i32
    %c0_i32_0 = arith.constant 0 : i32
    return %c0_i32, %arg0 : i32, i32
  }
  func.func @transform_1(%arg0: i32) -> (i32, i32) {
    %c0_i32 = arith.constant 0 : i32
    %c0_i32_0 = arith.constant 0 : i32
    %c0_i32_1 = arith.constant 0 : i32
    return %c0_i32, %c0_i32_0 : i32, i32
  }
  func.func @transform_2(%arg0: i32) -> (i32, i32) {
    %c0_i32 = arith.constant 0 : i32
    %c0_i32_0 = arith.constant 0 : i32
    %c0_i32_1 = arith.constant 0 : i32
    return %c0_i32, %c0_i32_0 : i32, i32
  }
  func.func @transform_3(%arg0: i32) -> (i32, i32) {
    %c0_i32 = arith.constant 0 : i32
    %c0_i32_0 = arith.constant 0 : i32
    %c0_i32_1 = arith.constant 0 : i32
    return %c0_i32, %c0_i32_0 : i32, i32
  }
  func.func @transform_4(%arg0: i32) -> (i32, i32) {
    %c0_i32 = arith.constant 0 : i32
    %c0_i32_0 = arith.constant 0 : i32
    %c0_i32_1 = arith.constant 0 : i32
    return %c0_i32, %c0_i32_0 : i32, i32
  }
  func.func @transform_5(%arg0: i32) -> (i32, i32) {
    %c0_i32 = arith.constant 0 : i32
    %c0_i32_0 = arith.constant 0 : i32
    return %c0_i32, %arg0 : i32, i32
  }
}

</mosaic_0001>

<bundles_post_ra>
// kernel: tpu_custom_call.1
= control target key start
LH: loop header
LB: loop body
LE: loop exit
PB: predicated region body
PF: predicated region fallthrough
CT: control target
= control target key end

     0   :  { %v218_v1 = vmov 0   ;;  %s283_s0 = inlined_call_operand.vmem [shape: f32[8,128], index: 0, kind: input, shape index: {}]   ;;  %s284_s1 = inlined_call_operand.vmem [shape: f32[8,1], index: 1, kind: input, shape index: {}]   ;;  %s285_s2 = inlined_call_operand.vmem [shape: f32[8,1], index: 2, kind: input, shape index: {}]   ;;  %s286_s3 = inlined_call_operand.vmem [shape: f32[8,24], index: 3, kind: input, shape index: {}]   ;;  %s287_s4 = inlined_call_operand.vmem [shape: f32[8,1], index: 4, kind: input, shape index: {}]   ;;  %s288_s5 = inlined_call_operand.hbm [shape: f32[8,128], index: 5, kind: output, shape index: {}]  }
   0x1   :  { %v22_v0 = vld [vmem:[%s284_s1] sm:$0xff]  ;;  %191 = vset.pattern.permute.xlu0 %v218_v1 }
   0x2   :  { %10 = vsyncpa [#allocation3], 0  ;;  %25 = vperm.xlu0 %191, %v22_v0   ;;  %v29_v2 = vld [vmem:[%s285_s2] sm:$0xff]  ;;  %v219_v10 = vmov 0.0|0.0   ;;  %vm220_vm0 = vmmov 0   ;;  %v221_v11 = vmov 0.0   ;;  %v41_v16 = vlaneseq }
   0x3   :  { %v64_v3 = vld [vmem:[%s287_s4] sm:$0xff]  ;;  %179 = vmatprep.subr.bf16.mxu0 %v219_v10  ;;  %176 = vmatprep.mubr.msk.f32.mxu0 %vm220_vm0, %v221_v11  ;;  %s222_s1 = smov 1   ;;  %s223_s2 = smov 127   ;;  %vm224_vm2 = vmmov 1   ;;  %vm70_vm5 = vcmask 195584  }
   0x4   :  { %v21_v5 = vld [vmem:[%s283_s0] sm:$0xff]  ;;  %v42_v17 = vand.u32 127, %v41_v16  ;;  %s225_s26 = smov [#allocation2]  }
   0x5   :  { %v63_v21 = vld [vmem:[%s286_s3] sm:$0xff]  ;;  %s151_s27 = sshll.u32 %s225_s26, 4  ;;  %s152_s27 = int_to_ptr.vmem [resolvable:$true] %s151_s27 }
   0x6   :  { %32 = vperm.xlu0 %191, %v29_v2   ;;  %v47_v18 = vand.u32 15, %v42_v17  ;;  %s194_s28 = scalar_lea.vmem %s152_s27, 128  ;;  %p199_p1 = scmp.lt.s32.totalorder %s152_s27, %s152_s27 }
   0x7   :  { %p195_p0 = scmp.ne.s32.totalorder %s152_s27, %s194_s28  ;;  %p200_p2 = scmp.lt.s32.totalorder %s194_s28, %s194_s28 }
   0x8   :  { %vm164_vm1 = vcmp.ne.s32.totalorder %v47_v18, 0  ;;  %vm165_vm4 = vcmp.ne.s32.totalorder %v47_v18, 15 }
   0x9   :  { %vm181_vm3 = vmpackc.low %vm224_vm2, %vm164_vm1  ;;  %p201_p3 = por %p200_p2, %p199_p1 }
   0xa   :  { %67 = vperm.xlu0 %191, %v64_v3  }
   0xb   :  { %p202_p4 = pnand %p201_p3, %p195_p0 }
  0x81   :  { %v26_v4 = vpop.permute.xlu0 %25 }
  0x82   :  { %v28_v6 = vmul.f32 %v26_v4, %v21_v5 }
  0x85   :  { %v33_v7 = vpop.permute.xlu0 %32 }
  0x86   :  { %v35_v8 = vadd.f32 %v33_v7, %v28_v6 }
  0x88   :  { %v37_v9 = vmul.f32 0.70710677, %v35_v8  ;;  %v36_v13 = vmul.f32 0.5, %v35_v8 }
  0x89   :  { %v68_v23 = vpop.permute.xlu0 %67 }
  0x8a   :  { %192 = verf.f32 %v37_v9 }
  0x94   :  { %v193_v12 = vpop.eup %192 }
  0x95   :  { %v39_v14 = vadd.f32 1.0, %v193_v12 }
  0x97   :  { %v40_v15 = vmul.f32 %v39_v14, %v36_v13 }
  0x99   :  { %56 = vrot.lane.b32.xlu1 %v40_v15, %s222_s1 }
  0x9d   :  { %60 = vrot.lane.b32.xlu1 %v40_v15, %s223_s2 }
 0x10b   :  { %v57_v19 = vpop.permute.xlu1 %56 }
 0x10c   :  { %v180_v20 = vpack.c.bf16 %v40_v15, %v57_v19 }
 0x10e   :  { %182 = vmatpush3.bf16.msk.msra.mxu0 %vm181_vm3, %v180_v20 }
 0x10f   :  { %174 = vmatprep.subr.mxu0 %v221_v11  ;;  %v61_v22 = vpop.permute.xlu1 %60 }
 0x112   :  { %175 = vmatpush3.msk.msra.mxu0 %vm165_vm4, %v61_v22 }
 0x113   :  { %177 = vmatmul.mubr.msk.f32.vlgmr.msra.gmra.mrb[0].mxu0 %vm70_vm5, %v63_v21 }
 0x1e6   :  { %v140_v24 = vpop.f32.mrb[0].mxu0 }
 0x1e7   :  { %v141_v25 = vadd.f32 %v140_v24, %v68_v23  ;;  %v178_v26 = vpop.f32.mrb[1].mxu0 }
 0x1e9   :  { %144 = vst [vmem:[#allocation2] sm:$0xff] %v141_v25 }
 0x1ea   :  { %205 = shalt.err (!%p202_p4)
}
 0x1eb   :  { %s206_s30 = scalar_lea.hbm %s288_s5, 128 }
 0x1ec   :  { %p207_p5 = scmp.ne.s32.totalorder %s288_s5, %s206_s30  ;;  %p210_p6 = scmp.lt.u32.totalorder %s206_s30, %s288_s5 }
 0x1ee   :  { %p212_p7 = pnand %p210_p6, %p207_p5 }
 0x1f0   :  { %215 = shalt.err (!%p212_p7)
}
 0x1f1   :  { %154 = dma.vmem_to_hbm [thread:$0]  %s152_s27, 128, %s288_s5, [#allocation3]  }
 0x1f2   :  { %216 = dma.done.wait [#allocation3], 128  }
 0x1f3   :  { %217 = vsyncadd [#allocation3], 4294967168 }
 0x1f4   :  { %158 = vsyncpa [#allocation3], 1 }

</bundles_post_ra>
